<compile_context>
chip_gen: v7x
topology: tpu7x:2x2x1
jax: 0.10.0
libtpu: 0.0.40
codegen_flags: <defaults>
</compile_context>

<pallas_src>
import jax
import jax.numpy as jnp
from jax.experimental import pallas as pl
from jax.experimental.pallas import tpu as pltpu

LN_EPS = 1e-5


def _round_up(a, m):
    return (a + m - 1) // m * m


def _mish(x):
    # Mish(x) = x * tanh(softplus(x)) = x * (e^2 + 2e) / (e^2 + 2e + 2), e = exp(x)
    # Clamp the exponent input: for x >= 20 the ratio is 1.0 in f32, so mish(x) ~= x.
    e = jnp.exp(jnp.minimum(x, 20.0))
    n = e * (e + 2.0)
    return x * n / (n + 2.0)


def _layernorm(x, gamma, beta):
    mean = jnp.mean(x, axis=-1, keepdims=True)
    var = jnp.mean((x - mean) ** 2, axis=-1, keepdims=True)  # biased, like torch LN
    inv = jax.lax.rsqrt(var + LN_EPS)
    return (x - mean) * inv * gamma + beta


def decoder_kernel(x_ref,
                   w1_ref, b1_ref, g1_ref, be1_ref,
                   w2_ref, b2_ref, g2_ref, be2_ref,
                   w3_ref, b3_ref,
                   o_ref,
                   h2_ref):
    # grid = (gene_outer [parallel], batch [parallel], gene_inner [arbitrary])
    j = pl.program_id(2)

    # Layers 1-2 depend only on the batch tile; compute them once per batch tile
    # (inner gene-tile index 0) and stash the result in VMEM scratch.  Padded
    # batch rows are all-zero -> LayerNorm sees var=0 -> rsqrt(eps): finite,
    # sliced off by the wrapper, so benign.
    @pl.when(j == 0)
    def _():
        x = x_ref[...]  # bf16 (bt, H)

        # Linear(H -> H) + LayerNorm(H) + Mish   (Dropout(p=0) is identity)
        h1 = jnp.dot(x, w1_ref[...], preferred_element_type=jnp.float32) + b1_ref[...]
        h1 = _mish(_layernorm(h1, g1_ref[...], be1_ref[...]))

        # Linear(H -> 2H) + LayerNorm(2H) + Mish
        h2 = jnp.dot(h1.astype(jnp.bfloat16), w2_ref[...],
                     preferred_element_type=jnp.float32) + b2_ref[...]
        h2 = _mish(_layernorm(h2, g2_ref[...], be2_ref[...]))
        h2_ref[...] = h2.astype(jnp.bfloat16)

    # Linear(2H -> num_genes), streamed over gene tiles (HBM-bound part).
    out = jnp.dot(h2_ref[...], w3_ref[...],
                  preferred_element_type=jnp.float32) + b3_ref[...]
    o_ref[...] = out.astype(o_ref.dtype)


def base_decoder_forward(x, params, *, batch_tile=512, gene_tile=2048,
                         out_dtype=jnp.bfloat16):
    """x: (B, H) float32 (or bf16).  params: dict of weights (see init_params)."""
    B, H = x.shape
    H2 = params["w2"].shape[1]
    G = params["w3"].shape[1]

    # ---- generation-aware VMEM budget --------------------------------------
    try:
        vmem_cap = int(pltpu.get_tpu_info().vmem_capacity_bytes)
    except Exception:
        vmem_cap = 64 * 2**20  # conservative fallback, safe on every generation
    # ~85% of physical VMEM: ~108 MiB on 128-MiB parts (v5e/v6e), ~54 MiB on v7x,
    # leaving headroom for Mosaic internal scratch / semaphores.
    vmem_limit = max(32 * 2**20, int(vmem_cap * 0.85))
    tile_budget = int(vmem_limit * 0.7)

    # ---- tile sizes ---------------------------------------------------------
    # gene tiles: multiples of 256 keep the 256-wide MXU output fully used on
    # v6e/v7x (128 suffices on v5e); batch tiles: multiples of 16 (bf16 sublanes).
    lane = 256 if G >= 256 else 128
    out_bytes = jnp.dtype(out_dtype).itemsize

    bt = _round_up(min(batch_tile, B), 16)
    gt = _round_up(min(gene_tile, _round_up(G, lane)), lane)

    def est_vmem(bt_, gt_):
        return (2 * bt_ * H * 2                              # x tile (bf16, 2 bufs)
                + 2 * ((H * H + H * H2) * 2 + 3 * (H + H2) * 4)  # w1,w2 + LN params
                + 3 * (H2 * gt_ * 2 + gt_ * 4)               # w3/b3 tiles (3-deep)
                + 2 * bt_ * gt_ * out_bytes                  # output tile
                + bt_ * H2 * 2                               # h2 scratch (bf16)
                + 4 * bt_ * H2 * 4)                          # f32 temps in j==0 body

    # Keep the j==0 branch + pipeline buffers within VMEM (prevents spills that
    # would stall the w3 prefetch pipeline) by shrinking tiles if needed.
    while est_vmem(bt, gt) > tile_budget:
        if gt > 512:
            gt = _round_up(gt // 2, lane)
        elif bt > 64:
            bt = _round_up(bt // 2, 16)
        elif gt > lane:
            gt = _round_up(gt // 2, lane)
        elif bt > 16:
            bt = _round_up(bt // 2, 16)
        else:
            break

    B_pad = _round_up(B, bt)
    n_bt = B_pad // bt
    n_gt_total = pl.cdiv(G, gt)
    # v7x small-batch: with a single batch tile only one TensorCore would be
    # busy; split the gene axis 2-way on a "parallel" outer axis (h2 recompute
    # per split is two tiny matmuls).  Harmless on single-core parts.
    n_go = 2 if (n_bt == 1 and n_gt_total >= 2) else 1
    n_gi = -(-n_gt_total // n_go)
    G_pad = n_go * n_gi * gt

    xb = x.astype(jnp.bfloat16)
    if B_pad != B:
        xb = jnp.pad(xb, ((0, B_pad - B), (0, 0)))
    w3, b3 = params["w3"], params["b3"]
    if G_pad != G:
        w3 = jnp.pad(w3, ((0, 0), (0, G_pad - G)))
        b3 = jnp.pad(b3, ((0, 0), (0, G_pad - G)))

    def call(use_buffered):
        def spec(shape, index_map, buffers=None):
            if use_buffered and buffers is not None and hasattr(pl, "Buffered"):
                try:
                    return pl.BlockSpec(shape, index_map,
                                        pipeline_mode=pl.Buffered(buffers))
                except TypeError:
                    pass
            return pl.BlockSpec(shape, index_map)

        # Constant (resident) operands: single-buffered — their block index never
        # changes, so extra buffers would only double VMEM.
        const = lambda shp: spec(shp, lambda go, i, j: (0, 0), buffers=1)

        return pl.pallas_call(
            decoder_kernel,
            out_shape=jax.ShapeDtypeStruct((B_pad, G_pad), out_dtype),
            grid_spec=pltpu.PrefetchScalarGridSpec(
                num_scalar_prefetch=0,
                grid=(n_go, n_bt, n_gi),
                in_specs=[
                    spec((bt, H), lambda go, i, j: (i, 0)),                      # x tile
                    const((H, H)), const((1, H)), const((1, H)), const((1, H)),  # layer 1
                    const((H, H2)), const((1, H2)), const((1, H2)), const((1, H2)),  # layer 2
                    # streamed layer-3 operands: 3-deep prefetch so the long
                    # j==0 step does not leave later gene tiles DMA-exposed.
                    spec((H2, gt), lambda go, i, j: (0, go * n_gi + j), buffers=3),
                    spec((1, gt), lambda go, i, j: (0, go * n_gi + j), buffers=3),
                ],
                out_specs=pl.BlockSpec((bt, gt), lambda go, i, j: (i, go * n_gi + j)),
                scratch_shapes=[pltpu.VMEM((bt, H2), jnp.bfloat16)],             # h2 reuse
            ),
            compiler_params=pltpu.CompilerParams(
                dimension_semantics=("parallel", "parallel", "arbitrary"),
                vmem_limit_bytes=vmem_limit,
            ),
        )(xb,
          params["w1"], params["b1"], params["g1"], params["be1"],
          params["w2"], params["b2"], params["g2"], params["be2"],
          w3, b3)

    try:
        out = call(True)
    except Exception:
        # pipeline_mode / Buffered not supported in this JAX build: fall back to
        # plain (double-buffered) BlockSpecs — identical semantics.
        out = call(False)
    return out[:B, :G]


def init_params(key, hidden_size, num_genes):
    H, H2 = hidden_size, hidden_size * 2
    ks = jax.random.split(key, 6)

    def lin(kw, kb, fan_in, fan_out):
        lim = 1.0 / jnp.sqrt(fan_in)
        w = jax.random.uniform(kw, (fan_in, fan_out), jnp.float32, -lim, lim)
        b = jax.random.uniform(kb, (1, fan_out), jnp.float32, -lim, lim)
        return w.astype(jnp.bfloat16), b  # bf16 weights, f32 biases

    w1, b1 = lin(ks[0], ks[1], H, H)
    w2, b2 = lin(ks[2], ks[3], H, H2)
    w3, b3 = lin(ks[4], ks[5], H2, num_genes)
    return dict(
        w1=w1, b1=b1, g1=jnp.ones((1, H), jnp.float32), be1=jnp.zeros((1, H), jnp.float32),
        w2=w2, b2=b2, g2=jnp.ones((1, H2), jnp.float32), be2=jnp.zeros((1, H2), jnp.float32),
        w3=w3, b3=b3,
    )


def reference_forward(x, p):
    """Pure-JAX reference matching the kernel's bf16 matmul inputs / f32 math."""
    f32 = lambda a: a.astype(jnp.float32)

    def ln(h, g, b):
        m = jnp.mean(h, axis=-1, keepdims=True)
        v = jnp.mean((h - m) ** 2, axis=-1, keepdims=True)
        return (h - m) * jax.lax.rsqrt(v + LN_EPS) * g + b

    mish = lambda h: h * jnp.tanh(jax.nn.softplus(h))

    xb = f32(x.astype(jnp.bfloat16))
    h = mish(ln(xb @ f32(p["w1"]) + p["b1"], p["g1"], p["be1"]))
    h = f32(h.astype(jnp.bfloat16))
    h = mish(ln(h @ f32(p["w2"]) + p["b2"], p["g2"], p["be2"]))
    h = f32(h.astype(jnp.bfloat16))
    return h @ f32(p["w3"]) + p["b3"]


if __name__ == "__main__":
    hidden_size = 128   # module default
    num_genes = 256
    batch = 16

    key = jax.random.PRNGKey(0)
    kx, kp = jax.random.split(key)
    x = jax.random.normal(kx, (batch, hidden_size), jnp.float32)
    params = init_params(kp, hidden_size, num_genes)

    out = base_decoder_forward(x, params)
    out = jax.block_until_ready(out)

    ref = reference_forward(x, params)
    assert out.shape == (batch, num_genes)
    assert jnp.allclose(out.astype(jnp.float32), ref, atol=2e-2, rtol=2e-2), \
        "mismatch vs reference"
    print("KERNEL_OK")
</pallas_src>

<mosaic_0001>
module attributes {stable_mosaic.version = 11 : i64} {
  func.func @decoder_kernel(%arg0: i32, %arg1: i32, %arg2: i32, %arg3: memref<16x128xbf16, #tpu.memory_space<vmem>>, %arg4: memref<128x128xbf16, #tpu.memory_space<vmem>>, %arg5: memref<1x128xf32, #tpu.memory_space<vmem>>, %arg6: memref<1x128xf32, #tpu.memory_space<vmem>>, %arg7: memref<1x128xf32, #tpu.memory_space<vmem>>, %arg8: memref<128x256xbf16, #tpu.memory_space<vmem>>, %arg9: memref<1x256xf32, #tpu.memory_space<vmem>>, %arg10: memref<1x256xf32, #tpu.memory_space<vmem>>, %arg11: memref<1x256xf32, #tpu.memory_space<vmem>>, %arg12: memref<256x256xbf16, #tpu.memory_space<vmem>>, %arg13: memref<1x256xf32, #tpu.memory_space<vmem>>, %arg14: memref<16x256xbf16, #tpu.memory_space<vmem>>, %arg15: memref<16x256xbf16, #tpu.memory_space<vmem>>) attributes {dimension_semantics = [#tpu.dimension_semantics<parallel>, #tpu.dimension_semantics<parallel>, #tpu.dimension_semantics<arbitrary>], iteration_bounds = array<i64: 1, 1, 1>, scalar_prefetch = 0 : i64, scratch_operands = 1 : i64, tpu.core_type = #tpu.core_type<tc>, window_params = [{transform_indices = @transform_0, window_bounds = array<i64: 16, 128>}, {pipeline_mode = #tpu.pipeline_mode<synchronous>, transform_indices = @transform_1, window_bounds = array<i64: 128, 128>}, {pipeline_mode = #tpu.pipeline_mode<synchronous>, transform_indices = @transform_2, window_bounds = array<i64: 1, 128>}, {pipeline_mode = #tpu.pipeline_mode<synchronous>, transform_indices = @transform_3, window_bounds = array<i64: 1, 128>}, {pipeline_mode = #tpu.pipeline_mode<synchronous>, transform_indices = @transform_4, window_bounds = array<i64: 1, 128>}, {pipeline_mode = #tpu.pipeline_mode<synchronous>, transform_indices = @transform_5, window_bounds = array<i64: 128, 256>}, {pipeline_mode = #tpu.pipeline_mode<synchronous>, transform_indices = @transform_6, window_bounds = array<i64: 1, 256>}, {pipeline_mode = #tpu.pipeline_mode<synchronous>, transform_indices = @transform_7, window_bounds = array<i64: 1, 256>}, {pipeline_mode = #tpu.pipeline_mode<synchronous>, transform_indices = @transform_8, window_bounds = array<i64: 1, 256>}, {transform_indices = @transform_9, window_bounds = array<i64: 256, 256>}, {transform_indices = @transform_10, window_bounds = array<i64: 1, 256>}, {transform_indices = @transform_11, window_bounds = array<i64: 16, 256>}]} {
    %c0_i32 = arith.constant 0 : i32
    %0 = arith.cmpi eq, %arg2, %c0_i32 : i32
    %1 = arith.extui %0 : i1 to i32
    %c0_i32_0 = arith.constant 0 : i32
    %2 = arith.cmpi ne, %1, %c0_i32_0 : i32
    scf.if %2 {
      %c0_8 = arith.constant 0 : index
      %c0_9 = arith.constant 0 : index
      %11 = vector.load %arg3[%c0_8, %c0_9] : memref<16x128xbf16, #tpu.memory_space<vmem>>, vector<16x128xbf16>
      %c0_10 = arith.constant 0 : index
      %c0_11 = arith.constant 0 : index
      %12 = vector.load %arg4[%c0_10, %c0_11] : memref<128x128xbf16, #tpu.memory_space<vmem>>, vector<128x128xbf16>
      %cst_12 = arith.constant dense<0.000000e+00> : vector<16x128xf32>
      %13 = tpu.matmul %11, %12, %cst_12 {dimension_numbers = #tpu.dot_dimension_numbers<[1], [0], [0], [1], [0, 0, 1, 1], [], []>} : vector<16x128xbf16>, vector<128x128xbf16>, vector<16x128xf32> -> vector<16x128xf32>
      %c0_13 = arith.constant 0 : index
      %c0_14 = arith.constant 0 : index
      %14 = vector.load %arg5[%c0_13, %c0_14] : memref<1x128xf32, #tpu.memory_space<vmem>>, vector<1x128xf32>
      %15 = vector.broadcast %14 : vector<1x128xf32> to vector<16x128xf32>
      %16 = arith.addf %13, %15 : vector<16x128xf32>
      %c0_15 = arith.constant 0 : index
      %c0_16 = arith.constant 0 : index
      %17 = vector.load %arg6[%c0_15, %c0_16] : memref<1x128xf32, #tpu.memory_space<vmem>>, vector<1x128xf32>
      %c0_17 = arith.constant 0 : index
      %c0_18 = arith.constant 0 : index
      %18 = vector.load %arg7[%c0_17, %c0_18] : memref<1x128xf32, #tpu.memory_space<vmem>>, vector<1x128xf32>
      %cst_19 = arith.constant dense<0.000000e+00> : vector<16xf32>
      %19 = vector.multi_reduction <add>, %16, %cst_19 [1] : vector<16x128xf32> to vector<16xf32>
      %20 = vector.shape_cast %19 : vector<16xf32> to vector<16x1xf32>
      %cst_20 = arith.constant 1.280000e+02 : f32
      %21 = vector.broadcast %cst_20 : f32 to vector<16x1xf32>
      %22 = arith.divf %20, %21 : vector<16x1xf32>
      %23 = vector.broadcast %22 : vector<16x1xf32> to vector<16x128xf32>
      %24 = arith.subf %16, %23 : vector<16x128xf32>
      %25 = arith.mulf %24, %24 : vector<16x128xf32>
      %cst_21 = arith.constant dense<0.000000e+00> : vector<16xf32>
      %26 = vector.multi_reduction <add>, %25, %cst_21 [1] : vector<16x128xf32> to vector<16xf32>
      %27 = vector.shape_cast %26 : vector<16xf32> to vector<16x1xf32>
      %cst_22 = arith.constant 1.280000e+02 : f32
      %28 = vector.broadcast %cst_22 : f32 to vector<16x1xf32>
      %29 = arith.divf %27, %28 : vector<16x1xf32>
      %cst_23 = arith.constant 9.99999974E-6 : f32
      %30 = vector.broadcast %cst_23 : f32 to vector<16x1xf32>
      %31 = arith.addf %29, %30 : vector<16x1xf32>
      %32 = math.rsqrt %31 : vector<16x1xf32>
      %33 = vector.broadcast %22 : vector<16x1xf32> to vector<16x128xf32>
      %34 = arith.subf %16, %33 : vector<16x128xf32>
      %35 = vector.broadcast %32 : vector<16x1xf32> to vector<16x128xf32>
      %36 = arith.mulf %34, %35 : vector<16x128xf32>
      %37 = vector.broadcast %17 : vector<1x128xf32> to vector<16x128xf32>
      %38 = arith.mulf %36, %37 : vector<16x128xf32>
      %39 = vector.broadcast %18 : vector<1x128xf32> to vector<16x128xf32>
      %40 = arith.addf %38, %39 : vector<16x128xf32>
      %cst_24 = arith.constant 2.000000e+01 : f32
      %41 = vector.broadcast %cst_24 : f32 to vector<16x128xf32>
      %42 = arith.minimumf %40, %41 : vector<16x128xf32>
      %43 = math.exp %42 : vector<16x128xf32>
      %cst_25 = arith.constant 2.000000e+00 : f32
      %44 = vector.broadcast %cst_25 : f32 to vector<16x128xf32>
      %45 = arith.addf %43, %44 : vector<16x128xf32>
      %46 = arith.mulf %43, %45 : vector<16x128xf32>
      %47 = arith.mulf %40, %46 : vector<16x128xf32>
      %cst_26 = arith.constant 2.000000e+00 : f32
      %48 = vector.broadcast %cst_26 : f32 to vector<16x128xf32>
      %49 = arith.addf %46, %48 : vector<16x128xf32>
      %50 = arith.divf %47, %49 : vector<16x128xf32>
      %51 = arith.truncf %50 : vector<16x128xf32> to vector<16x128xbf16>
      %c0_27 = arith.constant 0 : index
      %c0_28 = arith.constant 0 : index
      %52 = vector.load %arg8[%c0_27, %c0_28] : memref<128x256xbf16, #tpu.memory_space<vmem>>, vector<128x256xbf16>
      %cst_29 = arith.constant dense<0.000000e+00> : vector<16x256xf32>
      %53 = tpu.matmul %51, %52, %cst_29 {dimension_numbers = #tpu.dot_dimension_numbers<[1], [0], [0], [1], [0, 0, 1, 1], [], []>} : vector<16x128xbf16>, vector<128x256xbf16>, vector<16x256xf32> -> vector<16x256xf32>
      %c0_30 = arith.constant 0 : index
      %c0_31 = arith.constant 0 : index
      %54 = vector.load %arg9[%c0_30, %c0_31] : memref<1x256xf32, #tpu.memory_space<vmem>>, vector<1x256xf32>
      %55 = vector.broadcast %54 : vector<1x256xf32> to vector<16x256xf32>
      %56 = arith.addf %53, %55 : vector<16x256xf32>
      %c0_32 = arith.constant 0 : index
      %c0_33 = arith.constant 0 : index
      %57 = vector.load %arg10[%c0_32, %c0_33] : memref<1x256xf32, #tpu.memory_space<vmem>>, vector<1x256xf32>
      %c0_34 = arith.constant 0 : index
      %c0_35 = arith.constant 0 : index
      %58 = vector.load %arg11[%c0_34, %c0_35] : memref<1x256xf32, #tpu.memory_space<vmem>>, vector<1x256xf32>
      %cst_36 = arith.constant dense<0.000000e+00> : vector<16xf32>
      %59 = vector.multi_reduction <add>, %56, %cst_36 [1] : vector<16x256xf32> to vector<16xf32>
      %60 = vector.shape_cast %59 : vector<16xf32> to vector<16x1xf32>
      %cst_37 = arith.constant 2.560000e+02 : f32
      %61 = vector.broadcast %cst_37 : f32 to vector<16x1xf32>
      %62 = arith.divf %60, %61 : vector<16x1xf32>
      %63 = vector.broadcast %62 : vector<16x1xf32> to vector<16x256xf32>
      %64 = arith.subf %56, %63 : vector<16x256xf32>
      %65 = arith.mulf %64, %64 : vector<16x256xf32>
      %cst_38 = arith.constant dense<0.000000e+00> : vector<16xf32>
      %66 = vector.multi_reduction <add>, %65, %cst_38 [1] : vector<16x256xf32> to vector<16xf32>
      %67 = vector.shape_cast %66 : vector<16xf32> to vector<16x1xf32>
      %cst_39 = arith.constant 2.560000e+02 : f32
      %68 = vector.broadcast %cst_39 : f32 to vector<16x1xf32>
      %69 = arith.divf %67, %68 : vector<16x1xf32>
      %cst_40 = arith.constant 9.99999974E-6 : f32
      %70 = vector.broadcast %cst_40 : f32 to vector<16x1xf32>
      %71 = arith.addf %69, %70 : vector<16x1xf32>
      %72 = math.rsqrt %71 : vector<16x1xf32>
      %73 = vector.broadcast %62 : vector<16x1xf32> to vector<16x256xf32>
      %74 = arith.subf %56, %73 : vector<16x256xf32>
      %75 = vector.broadcast %72 : vector<16x1xf32> to vector<16x256xf32>
      %76 = arith.mulf %74, %75 : vector<16x256xf32>
      %77 = vector.broadcast %57 : vector<1x256xf32> to vector<16x256xf32>
      %78 = arith.mulf %76, %77 : vector<16x256xf32>
      %79 = vector.broadcast %58 : vector<1x256xf32> to vector<16x256xf32>
      %80 = arith.addf %78, %79 : vector<16x256xf32>
      %cst_41 = arith.constant 2.000000e+01 : f32
      %81 = vector.broadcast %cst_41 : f32 to vector<16x256xf32>
      %82 = arith.minimumf %80, %81 : vector<16x256xf32>
      %83 = math.exp %82 : vector<16x256xf32>
      %cst_42 = arith.constant 2.000000e+00 : f32
      %84 = vector.broadcast %cst_42 : f32 to vector<16x256xf32>
      %85 = arith.addf %83, %84 : vector<16x256xf32>
      %86 = arith.mulf %83, %85 : vector<16x256xf32>
      %87 = arith.mulf %80, %86 : vector<16x256xf32>
      %cst_43 = arith.constant 2.000000e+00 : f32
      %88 = vector.broadcast %cst_43 : f32 to vector<16x256xf32>
      %89 = arith.addf %86, %88 : vector<16x256xf32>
      %90 = arith.divf %87, %89 : vector<16x256xf32>
      %91 = arith.truncf %90 : vector<16x256xf32> to vector<16x256xbf16>
      %c0_44 = arith.constant 0 : index
      %c0_45 = arith.constant 0 : index
      %92 = vector.load %arg15[%c0_44, %c0_45] : memref<16x256xbf16, #tpu.memory_space<vmem>>, vector<16x256xbf16>
      tpu.vector_store %arg15[%c0_44, %c0_45], %91 {strides = array<i32>} : memref<16x256xbf16, #tpu.memory_space<vmem>>, vector<16x256xbf16>,
    } else {
    }
    %c0 = arith.constant 0 : index
    %c0_1 = arith.constant 0 : index
    %3 = vector.load %arg15[%c0, %c0_1] : memref<16x256xbf16, #tpu.memory_space<vmem>>, vector<16x256xbf16>
    %c0_2 = arith.constant 0 : index
    %c0_3 = arith.constant 0 : index
    %4 = vector.load %arg12[%c0_2, %c0_3] : memref<256x256xbf16, #tpu.memory_space<vmem>>, vector<256x256xbf16>
    %cst = arith.constant dense<0.000000e+00> : vector<16x256xf32>
    %5 = tpu.matmul %3, %4, %cst {dimension_numbers = #tpu.dot_dimension_numbers<[1], [0], [0], [1], [0, 0, 1, 1], [], []>} : vector<16x256xbf16>, vector<256x256xbf16>, vector<16x256xf32> -> vector<16x256xf32>
    %c0_4 = arith.constant 0 : index
    %c0_5 = arith.constant 0 : index
    %6 = vector.load %arg13[%c0_4, %c0_5] : memref<1x256xf32, #tpu.memory_space<vmem>>, vector<1x256xf32>
    %7 = vector.broadcast %6 : vector<1x256xf32> to vector<16x256xf32>
    %8 = arith.addf %5, %7 : vector<16x256xf32>
    %9 = arith.truncf %8 : vector<16x256xf32> to vector<16x256xbf16>
    %c0_6 = arith.constant 0 : index
    %c0_7 = arith.constant 0 : index
    %10 = vector.load %arg14[%c0_6, %c0_7] : memref<16x256xbf16, #tpu.memory_space<vmem>>, vector<16x256xbf16>
    tpu.vector_store %arg14[%c0_6, %c0_7], %9 {strides = array<i32>} : memref<16x256xbf16, #tpu.memory_space<vmem>>, vector<16x256xbf16>,
    return
  }
  func.func @transform_0(%arg0: i32, %arg1: i32, %arg2: i32) -> (i32, i32) {
    %c0_i32 = arith.constant 0 : i32
    %c0_i32_0 = arith.constant 0 : i32
    return %arg1, %c0_i32 : i32, i32
  }
  func.func @transform_1(%arg0: i32, %arg1: i32, %arg2: i32) -> (i32, i32) {
    %c0_i32 = arith.constant 0 : i32
    %c0_i32_0 = arith.constant 0 : i32
    %c0_i32_1 = arith.constant 0 : i32
    return %c0_i32, %c0_i32_0 : i32, i32
  }
  func.func @transform_2(%arg0: i32, %arg1: i32, %arg2: i32) -> (i32, i32) {
    %c0_i32 = arith.constant 0 : i32
    %c0_i32_0 = arith.constant 0 : i32
    %c0_i32_1 = arith.constant 0 : i32
    return %c0_i32, %c0_i32_0 : i32, i32
  }
  func.func @transform_3(%arg0: i32, %arg1: i32, %arg2: i32) -> (i32, i32) {
    %c0_i32 = arith.constant 0 : i32
    %c0_i32_0 = arith.constant 0 : i32
    %c0_i32_1 = arith.constant 0 : i32
    return %c0_i32, %c0_i32_0 : i32, i32
  }
  func.func @transform_4(%arg0: i32, %arg1: i32, %arg2: i32) -> (i32, i32) {
    %c0_i32 = arith.constant 0 : i32
    %c0_i32_0 = arith.constant 0 : i32
    %c0_i32_1 = arith.constant 0 : i32
    return %c0_i32, %c0_i32_0 : i32, i32
  }
  func.func @transform_5(%arg0: i32, %arg1: i32, %arg2: i32) -> (i32, i32) {
    %c0_i32 = arith.constant 0 : i32
    %c0_i32_0 = arith.constant 0 : i32
    %c0_i32_1 = arith.constant 0 : i32
    return %c0_i32, %c0_i32_0 : i32, i32
  }
  func.func @transform_6(%arg0: i32, %arg1: i32, %arg2: i32) -> (i32, i32) {
    %c0_i32 = arith.constant 0 : i32
    %c0_i32_0 = arith.constant 0 : i32
    %c0_i32_1 = arith.constant 0 : i32
    return %c0_i32, %c0_i32_0 : i32, i32
  }
  func.func @transform_7(%arg0: i32, %arg1: i32, %arg2: i32) -> (i32, i32) {
    %c0_i32 = arith.constant 0 : i32
    %c0_i32_0 = arith.constant 0 : i32
    %c0_i32_1 = arith.constant 0 : i32
    return %c0_i32, %c0_i32_0 : i32, i32
  }
  func.func @transform_8(%arg0: i32, %arg1: i32, %arg2: i32) -> (i32, i32) {
    %c0_i32 = arith.constant 0 : i32
    %c0_i32_0 = arith.constant 0 : i32
    %c0_i32_1 = arith.constant 0 : i32
    return %c0_i32, %c0_i32_0 : i32, i32
  }
  func.func @transform_9(%arg0: i32, %arg1: i32, %arg2: i32) -> (i32, i32) {
    %c1_i32 = arith.constant 1 : i32
    %0 = arith.muli %arg0, %c1_i32 : i32
    %1 = arith.addi %0, %arg2 : i32
    %c0_i32 = arith.constant 0 : i32
    %c0_i32_0 = arith.constant 0 : i32
    return %c0_i32, %1 : i32, i32
  }
  func.func @transform_10(%arg0: i32, %arg1: i32, %arg2: i32) -> (i32, i32) {
    %c1_i32 = arith.constant 1 : i32
    %0 = arith.muli %arg0, %c1_i32 : i32
    %1 = arith.addi %0, %arg2 : i32
    %c0_i32 = arith.constant 0 : i32
    %c0_i32_0 = arith.constant 0 : i32
    return %c0_i32, %1 : i32, i32
  }
  func.func @transform_11(%arg0: i32, %arg1: i32, %arg2: i32) -> (i32, i32) {
    %c1_i32 = arith.constant 1 : i32
    %0 = arith.muli %arg0, %c1_i32 : i32
    %1 = arith.addi %0, %arg2 : i32
    %c0_i32 = arith.constant 0 : i32
    return %arg1, %1 : i32, i32
  }
}

</mosaic_0001>

<bundles_post_ra>
// kernel: tpu_custom_call.1
= control target key start
LH: loop header
LB: loop body
LE: loop exit
PB: predicated region body
PF: predicated region fallthrough
CT: control target
= control target key end

     0   :  { %16 = vsyncpa [#allocation4], 0  ;;  %s1388_s0 = inlined_call_operand.hbm [shape: bf16[16,128], index: 0, kind: input, shape index: {}]   ;;  %s1389_s1 = inlined_call_operand.hbm [shape: bf16[128,128], index: 1, kind: input, shape index: {}]   ;;  %s1390_s2 = inlined_call_operand.vmem [shape: f32[1,128], index: 2, kind: input, shape index: {}]   ;;  %s1391_s3 = inlined_call_operand.vmem [shape: f32[1,128], index: 3, kind: input, shape index: {}]   ;;  %s1392_s4 = inlined_call_operand.vmem [shape: f32[1,128], index: 4, kind: input, shape index: {}]   ;;  %s1393_s5 = inlined_call_operand.hbm [shape: bf16[128,256], index: 5, kind: input, shape index: {}]   ;;  %s1394_s6 = inlined_call_operand.vmem [shape: f32[1,256], index: 6, kind: input, shape index: {}]   ;;  %s1395_s7 = inlined_call_operand.vmem [shape: f32[1,256], index: 7, kind: input, shape index: {}]   ;;  %s1396_s8 = inlined_call_operand.vmem [shape: f32[1,256], index: 8, kind: input, shape index: {}]   ;;  %s1397_s9 = inlined_call_operand.hbm [shape: bf16[256,256], index: 9, kind: input, shape index: {}]   ;;  %s1398_s10 = inlined_call_operand.vmem [shape: f32[1,256], index: 10, kind: input, shape index: {}]   ;;  %s1399_s11 = inlined_call_operand.hbm [shape: bf16[16,256], index: 11, kind: output, shape index: {}]  }
   0x1   :  { %17 = vsyncpa [#allocation7], 0 }
   0x2   :  { %18 = vsyncpa [#allocation10], 0 }
   0x3   :  { %19 = vsyncpa [#allocation5], 0  ;;  %s1187_s17 = smov [#allocation6]   ;;  %s1188_s19 = smov [#allocation3]  }
   0x4   :  { %s37_s18 = sshll.u32 %s1187_s17, 4  ;;  %s25_s20 = sshll.u32 %s1188_s19, 4  ;;  %s38_s18 = int_to_ptr.vmem [resolvable:$true] %s37_s18  ;;  %s1259_s20 = int_to_ptr.vmem [resolvable:$true] %s25_s20 }
   0x5   :  { %s1069_s23 = scalar_lea.hbm %s1389_s1, 1024 }
   0x6   :  { %p1070_p0 = scmp.ne.s32.totalorder %s1389_s1, %s1069_s23  ;;  %p1073_p1 = scmp.lt.u32.totalorder %s1069_s23, %s1389_s1 }
   0x8   :  { %p1075_p2 = pnand %p1073_p1, %p1070_p0 }
   0xa   :  { %1078 = shalt.err (!%p1075_p2)
}
   0xb   :  { %s1079_s28 = scalar_lea.vmem %s38_s18, 1024  ;;  %p1084_p4 = scmp.lt.s32.totalorder %s38_s18, %s38_s18 }
   0xc   :  { %p1080_p3 = scmp.ne.s32.totalorder %s38_s18, %s1079_s28  ;;  %p1085_p5 = scmp.lt.s32.totalorder %s1079_s28, %s1079_s28 }
   0xe   :  { %p1086_p6 = por %p1085_p5, %p1084_p4 }
  0x10   :  { %p1087_p7 = pnand %p1086_p6, %p1080_p3 }
  0x12   :  { %1090 = shalt.err (!%p1087_p7)
}
  0x13   :  { %s1189_s29 = smov 64   ;;  %s1190_s30 = smov 4  }
  0x14   :  { %43 = dma.hbm_to_vmem [thread:$0]  %s1389_s1, 1024, %s38_s18, [#allocation7], %s1189_s29, %s1189_s29, %s1190_s30  }
  0x15   :  { %s1091_s16 = scalar_lea.hbm %s1388_s0, 128 }
  0x16   :  { %p1092_p8 = scmp.ne.s32.totalorder %s1388_s0, %s1091_s16  ;;  %p1095_p9 = scmp.lt.u32.totalorder %s1091_s16, %s1388_s0 }
  0x18   :  { %p1097_p10 = pnand %p1095_p9, %p1092_p8 }
  0x1a   :  { %1100 = shalt.err (!%p1097_p10)
}
  0x1b   :  { %s1101_s23 = scalar_lea.vmem %s1259_s20, 128  ;;  %p1106_p12 = scmp.lt.s32.totalorder %s1259_s20, %s1259_s20 }
  0x1c   :  { %p1102_p11 = scmp.ne.s32.totalorder %s1259_s20, %s1101_s23  ;;  %p1107_p13 = scmp.lt.s32.totalorder %s1101_s23, %s1101_s23 }
  0x1e   :  { %p1108_p0 = por %p1107_p13, %p1106_p12 }
  0x20   :  { %p1109_p1 = pnand %p1108_p0, %p1102_p11 }
  0x22   :  { %1112 = shalt.err (!%p1109_p1)
}
  0x23   :  { %31 = dma.hbm_to_vmem [thread:$0]  %s1388_s0, 128, %s1259_s20, [#allocation4], %s1189_s29, %s1189_s29, %s1190_s30  }
  0x24   :  { %s1191_s24 = smov [#allocation8]   ;;  %s1113_s28 = scalar_lea.hbm %s1393_s5, 2048 }
  0x25   :  { %s55_s25 = sshll.u32 %s1191_s24, 4  ;;  %p1114_p2 = scmp.ne.s32.totalorder %s1393_s5, %s1113_s28  ;;  %s56_s25 = int_to_ptr.vmem [resolvable:$true] %s55_s25 }
  0x26   :  { %p1117_p3 = scmp.lt.u32.totalorder %s1113_s28, %s1393_s5 }
  0x28   :  { %p1119_p4 = pnand %p1117_p3, %p1114_p2 }
  0x2a   :  { %1122 = shalt.err (!%p1119_p4)
}
  0x2b   :  { %s1123_s16 = scalar_lea.vmem %s56_s25, 2048  ;;  %p1128_p6 = scmp.lt.s32.totalorder %s56_s25, %s56_s25 }
  0x2c   :  { %p1124_p5 = scmp.ne.s32.totalorder %s56_s25, %s1123_s16  ;;  %p1129_p7 = scmp.lt.s32.totalorder %s1123_s16, %s1123_s16 }
  0x2e   :  { %p1130_p8 = por %p1129_p7, %p1128_p6 }
  0x30   :  { %p1131_p9 = pnand %p1130_p8, %p1124_p5 }
  0x32   :  { %1134 = shalt.err (!%p1131_p9)
}
  0x33   :  { %s1192_s0 = smov 128   ;;  %s1193_s20 = smov 8  }
  0x34   :  { %61 = dma.hbm_to_vmem [thread:$0]  %s1393_s5, 2048, %s56_s25, [#allocation7], %s1192_s0, %s1192_s0, %s1193_s20  }
  0x35   :  { %s1194_s17 = smov [#allocation9]   ;;  %s1135_s23 = scalar_lea.hbm %s1397_s9, 4096 }
  0x36   :  { %s77_s19 = sshll.u32 %s1194_s17, 4  ;;  %p1136_p10 = scmp.ne.s32.totalorder %s1397_s9, %s1135_s23  ;;  %s78_s19 = int_to_ptr.vmem [resolvable:$true] %s77_s19 }
  0x37   :  { %p1139_p11 = scmp.lt.u32.totalorder %s1135_s23, %s1397_s9 }
  0x39   :  { %p1141_p12 = pnand %p1139_p11, %p1136_p10 }
  0x3b   :  { %1144 = shalt.err (!%p1141_p12)
}
  0x3c   :  { %s1145_s27 = scalar_lea.vmem %s78_s19, 4096  ;;  %p1150_p0 = scmp.lt.s32.totalorder %s78_s19, %s78_s19 }
  0x3d   :  { %p1146_p13 = scmp.ne.s32.totalorder %s78_s19, %s1145_s27  ;;  %p1151_p1 = scmp.lt.s32.totalorder %s1145_s27, %s1145_s27 }
  0x3f   :  { %p1152_p2 = por %p1151_p1, %p1150_p0 }
  0x41   :  { %p1153_p3 = pnand %p1152_p2, %p1146_p13 }
  0x43   :  { %1156 = shalt.err (!%p1153_p3)
}
  0x44   :  { %83 = dma.hbm_to_vmem [thread:$0]  %s1397_s9, 4096, %s78_s19, [#allocation10], %s1192_s0, %s1192_s0, %s1193_s20  }
  0x45   :  { %1179 = dma.done.wait [#allocation4], 128  }
  0x46   :  { %1180 = vsyncadd [#allocation4], 4294967168 }
  0x47   :  { %1181 = dma.done.wait [#allocation7], 3072  }
  0x48   :  { %1182 = vsyncadd [#allocation7], 4294964224 }
  0x49   :  { %1183 = dma.done.wait [#allocation10], 4096  }
  0x4a   :  { %1184 = vsyncadd [#allocation10], 4294963200  ;;  %v1195_v0 = vmov 0.0   ;;  %vm1196_vm0 = vmmov 0   ;;  %v956_v1 = vld [vmem:[#allocation6] sm:$0xff]   ;;  %v957_v2 = vld [vmem:[#allocation6 + $0x8] sm:$0xff]  }
  0x4b   :  { %924 = vmatprep.subr.bf16.mxu1 %v1195_v0  ;;  %940 = vmatprep.mubr.msk.bf16.mxu1 %vm1196_vm0, %v1195_v0  ;;  %v958_v3 = vld [vmem:[#allocation6 + $0x10] sm:$0xff]   ;;  %v959_v4 = vld [vmem:[#allocation6 + $0x18] sm:$0xff]   ;;  %v960_v5 = vld [vmem:[#allocation6 + $0x20] sm:$0xff]   ;;  %v1197_v30 = vmov 0   ;;  %s1198_s30 = smov [#allocation11]  }
  0x4c   :  { %925 = vmatpush3.bf16.msra.mxu1 %v956_v1  ;;  %v961_v6 = vld [vmem:[#allocation6 + $0x28] sm:$0xff]   ;;  %v962_v7 = vld [vmem:[#allocation6 + $0x30] sm:$0xff]   ;;  %v963_v8 = vld [vmem:[#allocation6 + $0x38] sm:$0xff]   ;;  %s834_s17 = sshll.u32 %s1198_s30, 4  ;;  %s835_s17 = int_to_ptr.vmem [resolvable:$true] %s834_s17 }
  0x4d   :  { %926 = vmatprep.subr.bf16.mxu1 %v1195_v0  ;;  %v964_v9 = vld [vmem:[#allocation3] sm:$0xff]   ;;  %v965_v25 = vld [vmem:[#allocation8] ss:$8 sps:$4 sm:$0xff]   ;;  %v967_v26 = vld [vmem:[#allocation8 + $0x4] ss:$8 sps:$4 sm:$0xff]   ;;  %p1162_p5 = scmp.lt.s32.totalorder %s835_s17, %s835_s17 }
  0x4e   :  { %v851_v10 = vld [vmem:[%s1390_s2] ss:$0 sm:$0xff]  ;;  %v970_v27 = vld [vmem:[#allocation8 + $0x14] ss:$8 sps:$4 sm:$0xff]   ;;  %v973_v29 = vld [vmem:[#allocation8 + $0x24] ss:$8 sps:$4 sm:$0xff]  }
  0x4f   :  { %v968_v28 = vld [vmem:[#allocation8 + $0x10] ss:$8 sps:$4 sm:$0xff]   ;;  %v971_v31 = vld [vmem:[#allocation8 + $0x20] ss:$8 sps:$4 sm:$0xff]   ;;  %v976_v32 = vld [vmem:[#allocation8 + $0x34] ss:$8 sps:$4 sm:$0xff]  }
  0x50   :  { %927 = vmatpush3.bf16.msra.mxu1 %v957_v2  ;;  %v974_v33 = vld [vmem:[#allocation8 + $0x30] ss:$8 sps:$4 sm:$0xff]   ;;  %v979_v34 = vld [vmem:[#allocation8 + $0x44] ss:$8 sps:$4 sm:$0xff]   ;;  %v977_v35 = vld [vmem:[#allocation8 + $0x40] ss:$8 sps:$4 sm:$0xff]  }
  0x51   :  { %928 = vmatprep.subr.bf16.mxu1 %v1195_v0  ;;  %v982_v36 = vld [vmem:[#allocation8 + $0x54] ss:$8 sps:$4 sm:$0xff]   ;;  %v980_v37 = vld [vmem:[#allocation8 + $0x50] ss:$8 sps:$4 sm:$0xff]   ;;  %v985_v38 = vld [vmem:[#allocation8 + $0x64] ss:$8 sps:$4 sm:$0xff]  }
  0x52   :  { %v983_v39 = vld [vmem:[#allocation8 + $0x60] ss:$8 sps:$4 sm:$0xff]   ;;  %v988_v40 = vld [vmem:[#allocation8 + $0x74] ss:$8 sps:$4 sm:$0xff]   ;;  %v986_v41 = vld [vmem:[#allocation8 + $0x70] ss:$8 sps:$4 sm:$0xff]  }
  0x53   :  { %v861_v49 = vld [vmem:[%s1391_s3] ss:$0 sm:$0xff] }
  0x54   :  { %929 = vmatpush3.bf16.msra.mxu1 %v958_v3  ;;  %v862_v51 = vld [vmem:[%s1392_s4] ss:$0 sm:$0xff] }
  0x55   :  { %930 = vmatprep.subr.bf16.mxu1 %v1195_v0 }
  0x58   :  { %931 = vmatpush3.bf16.msra.mxu1 %v959_v4 }
  0x59   :  { %932 = vmatprep.subr.bf16.mxu1 %v1195_v0 }
  0x5c   :  { %933 = vmatpush3.bf16.msra.mxu1 %v960_v5 }
  0x5d   :  { %934 = vmatprep.subr.bf16.mxu1 %v1195_v0 }
  0x60   :  { %935 = vmatpush3.bf16.msra.mxu1 %v961_v6 }
  0x61   :  { %936 = vmatprep.subr.bf16.mxu1 %v1195_v0 }
  0x64   :  { %937 = vmatpush3.bf16.msra.mxu1 %v962_v7 }
  0x65   :  { %938 = vmatprep.subr.bf16.mxu1 %v1195_v0 }
  0x68   :  { %939 = vmatpush3.bf16.msra.mxu1 %v963_v8 }
  0x69   :  { %414 = vmatprep.subr.bf16.mxu1 %v967_v26 }
  0x6b   :  { %941 = vmatmul.mubr.bf16.vlgmr.msra.gmra.mrb[0].mxu1 %v964_v9 }
  0x6c   :  { %415 = vmatpush1.bf16.msra.mxu1 %v965_v25  ;;  %446 = vmatprep.mubr.bf16.mxu1 %v1197_v30  ;;  %v989_v30 = vld [vmem:[#allocation9 + $0x4] ss:$8 sps:$4 sm:$0xff]  }
  0x6d   :  { %416 = vmatprep.subr.bf16.mxu1 %v970_v27  ;;  %768 = vmatprep.subr.bf16.mxu0 %v989_v30 }
  0x70   :  { %417 = vmatpush1.bf16.msra.mxu1 %v968_v28 }
  0x71   :  { %418 = vmatprep.subr.bf16.mxu1 %v973_v29 }
  0x74   :  { %419 = vmatpush1.bf16.msra.mxu1 %v971_v31  ;;  %v991_v31 = vld [vmem:[#allocation9] ss:$8 sps:$4 sm:$0xff]  }
  0x75   :  { %420 = vmatprep.subr.bf16.mxu1 %v976_v32  ;;  %769 = vmatpush1.bf16.msra.mxu0 %v991_v31 }
  0x78   :  { %421 = vmatpush1.bf16.msra.mxu1 %v974_v33 }
  0x79   :  { %422 = vmatprep.subr.bf16.mxu1 %v979_v34 }
  0x7c   :  { %423 = vmatpush1.bf16.msra.mxu1 %v977_v35 }
  0x7d   :  { %424 = vmatprep.subr.bf16.mxu1 %v982_v36 }
  0x80   :  { %425 = vmatpush1.bf16.msra.mxu1 %v980_v37 }
  0x81   :  { %426 = vmatprep.subr.bf16.mxu1 %v985_v38 }
  0x84   :  { %427 = vmatpush1.bf16.msra.mxu1 %v983_v39 }
  0x85   :  { %428 = vmatprep.subr.bf16.mxu1 %v988_v40 }
  0x88   :  { %429 = vmatpush1.bf16.msra.mxu1 %v986_v41 }
 0x13e   :  { %v239_v11 = vpop.f32.mrb[0].mxu1 }
 0x13f   :  { %v240_v12 = vadd.f32 %v851_v10, %v239_v11  ;;  %v942_v13 = vpop.f32.mrb[1].mxu1 }
 0x140   :  { %v242_v14 = vpop.f32.mrb[2].mxu1  ;;  %v324_v13 = vlaneseq }
 0x141   :  { %248 = vadd.xlane.f32.xlu0 %v240_v12  ;;  %v943_v15 = vpop.f32.mrb[3].mxu1  ;;  %v243_v16 = vadd.f32 %v851_v10, %v242_v14 }
 0x142   :  { %v325_v14 = vshrl.u32 %v324_v13, 7 }
 0x144   :  { %v1329_v15 = vsub.s32 0, %v325_v14 }
 0x145   :  { %250 = vadd.xlane.f32.xlu0 %v243_v16 }
 0x1ce   :  { %v249_v17 = vpop.xlane.xlu0 %248 }
 0x1cf   :  { %v253_v18 = vmul.f32 0.0078125, %v249_v17  ;;  %v1334_v17 = vsub.s32 1, %v325_v14 }
 0x1d1   :  { %v255_v19 = vsub.f32 %v240_v12, %v253_v18 }
 0x1d2   :  { %v251_v20 = vpop.xlane.xlu0 %250 }
 0x1d3   :  { %v254_v21 = vmul.f32 0.0078125, %v251_v20  ;;  %v257_v22 = vmul.f32 %v255_v19, %v255_v19 }
 0x1d5   :  { %v256_v23 = vsub.f32 %v243_v16, %v254_v21  ;;  %259 = vadd.xlane.f32.xlu1 %v257_v22  ;;  %v322_v16 = vld [vmem:[%s1394_s6] sm:$0x3] }
 0x1d6   :  { %v327_v18 = vrot.slane %v322_v16, %v1329_v15 }
 0x1d7   :  { %v258_v24 = vmul.f32 %v256_v23, %v256_v23 }
 0x1d9   :  { %261 = vadd.xlane.f32.xlu1 %v258_v24 }
 0x262   :  { %v260_v42 = vpop.xlane.xlu1 %259 }
 0x263   :  { %v263_v43 = vmul.f32 0.0078125, %v260_v42 }
 0x265   :  { %v265_v44 = vadd.f32 1e-05, %v263_v43 }
 0x266   :  { %v262_v45 = vpop.xlane.xlu1 %261 }
 0x267   :  { %1037 = vrsqrt.f32 %v265_v44  ;;  %v264_v46 = vmul.f32 0.0078125, %v262_v45 }
 0x269   :  { %v266_v47 = vadd.f32 1e-05, %v264_v46  ;;  %v992_v46 = vld [vmem:[#allocation9 + $0x14] ss:$8 sps:$4 sm:$0xff]  }
 0x26a   :  { %770 = vmatprep.subr.bf16.mxu0 %v992_v46 }
 0x26b   :  { %1039 = vrsqrt.f32 %v266_v47  ;;  %v994_v47 = vld [vmem:[#allocation9 + $0x10] ss:$8 sps:$4 sm:$0xff]  }
 0x26c   :  { %771 = vmatpush1.bf16.msra.mxu0 %v994_v47 }
 0x271   :  { %v1038_v48 = vpop.eup %1037 }
 0x272   :  { %v269_v50 = vmul.f32 %v1038_v48, %v255_v19  ;;  %v331_v19 = vrot.slane %v322_v16, %v1334_v17  ;;  %v995_v48 = vld [vmem:[#allocation9 + $0x24] ss:$8 sps:$4 sm:$0xff]  }
 0x273   :  { %772 = vmatprep.subr.bf16.mxu0 %v995_v48 }
 0x274   :  { %v277_v52 = vmul.f32 %v861_v49, %v269_v50  ;;  %v998_v50 = vld [vmem:[#allocation9 + $0x34] ss:$8 sps:$4 sm:$0xff]  }
 0x275   :  { %v1040_v53 = vpop.eup %1039 }
 0x276   :  { %v270_v54 = vmul.f32 %v1040_v53, %v256_v23  ;;  %v285_v55 = vadd.f32 %v862_v51, %v277_v52  ;;  %v1001_v52 = vld [vmem:[#allocation9 + $0x44] ss:$8 sps:$4 sm:$0xff]   ;;  %v1003_v53 = vld [vmem:[#allocation9 + $0x40] ss:$8 sps:$4 sm:$0xff]  }
 0x278   :  { %v278_v56 = vmul.f32 %v861_v49, %v270_v54  ;;  %v287_v57 = vmin.f32 %v285_v55, 20.0  ;;  %v997_v49 = vld [vmem:[#allocation9 + $0x20] ss:$8 sps:$4 sm:$0xff]   ;;  %v1004_v54 = vld [vmem:[#allocation9 + $0x54] ss:$8 sps:$4 sm:$0xff]  }
 0x279   :  { %773 = vmatpush1.bf16.msra.mxu0 %v997_v49 }
 0x27a   :  { %v286_v58 = vadd.f32 %v862_v51, %v278_v56  ;;  %v289_v59 = vmul.f32 1.442695, %v287_v57  ;;  %v1000_v51 = vld [vmem:[#allocation9 + $0x30] ss:$8 sps:$4 sm:$0xff]   ;;  %774 = vmatprep.subr.bf16.mxu0 %v998_v50  ;;  %v1007_v56 = vld [vmem:[#allocation9 + $0x64] ss:$8 sps:$4 sm:$0xff]  }
 0x27b   :  { %v1009_v57 = vld [vmem:[#allocation9 + $0x60] ss:$8 sps:$4 sm:$0xff]  }
 0x27c   :  { %v288_v60 = vmin.f32 %v286_v58, 20.0  ;;  %1041 = vpow2.f32 %v289_v59  ;;  %v1012_v59 = vld [vmem:[#allocation9 + $0x70] ss:$8 sps:$4 sm:$0xff]  }
 0x27d   :  { %775 = vmatpush1.bf16.msra.mxu0 %v1000_v51 }
 0x27e   :  { %v291_v61 = vmul.f32 1.442695, %v288_v60  ;;  %776 = vmatprep.subr.bf16.mxu0 %v1001_v52  ;;  %v1013_v60 = vld [vmem:[#allocation9 + $0x84] ss:$8 sps:$4 sm:$0xff]  }
 0x280   :  { %1043 = vpow2.f32 %v291_v61  ;;  %v1015_v61 = vld [vmem:[#allocation9 + $0x80] ss:$8 sps:$4 sm:$0xff]  }
 0x281   :  { %777 = vmatpush1.bf16.msra.mxu0 %v1003_v53 }
 0x282   :  { %778 = vmatprep.subr.bf16.mxu0 %v1004_v54 }
 0x286   :  { %v1042_v62 = vpop.eup %1041 }
 0x287   :  { %v293_v63 = vadd.f32 2.0, %v1042_v62 }
 0x289   :  { %v295_v0 = vmul.f32 %v1042_v62, %v293_v63  ;;  %v1016_v62 = vld [vmem:[#allocation9 + $0x94] ss:$8 sps:$4 sm:$0xff]   ;;  %v1018_v63 = vld [vmem:[#allocation9 + $0x90] ss:$8 sps:$4 sm:$0xff]  }
 0x28a   :  { %v1044_v1 = vpop.eup %1043 }
 0x28b   :  { %v294_v2 = vadd.f32 2.0, %v1044_v1  ;;  %v299_v3 = vadd.f32 2.0, %v295_v0  ;;  %v297_v7 = vmul.f32 %v295_v0, %v285_v55  ;;  %v1006_v55 = vld [vmem:[#allocation9 + $0x50] ss:$8 sps:$4 sm:$0xff]   ;;  %v1019_v0 = vld [vmem:[#allocation9 + $0xa4] ss:$8 sps:$4 sm:$0xff]  }
 0x28c   :  { %779 = vmatpush1.bf16.msra.mxu0 %v1006_v55 }
 0x28d   :  { %v296_v4 = vmul.f32 %v1044_v1, %v294_v2  ;;  %1045 = vrcp.f32 %v299_v3  ;;  %780 = vmatprep.subr.bf16.mxu0 %v1007_v56  ;;  %v1021_v1 = vld [vmem:[#allocation9 + $0xa0] ss:$8 sps:$4 sm:$0xff]   ;;  %v1022_v2 = vld [vmem:[#allocation9 + $0xb4] ss:$8 sps:$4 sm:$0xff]   ;;  %v1024_v3 = vld [vmem:[#allocation9 + $0xb0] ss:$8 sps:$4 sm:$0xff]  }
 0x28f   :  { %v300_v5 = vadd.f32 2.0, %v296_v4  ;;  %v298_v8 = vmul.f32 %v296_v4, %v286_v58  ;;  %v1010_v58 = vld [vmem:[#allocation9 + $0x74] ss:$8 sps:$4 sm:$0xff]   ;;  %v1025_v4 = vld [vmem:[#allocation9 + $0xc4] ss:$8 sps:$4 sm:$0xff]  }
 0x290   :  { %781 = vmatpush1.bf16.msra.mxu0 %v1009_v57 }
 0x291   :  { %1047 = vrcp.f32 %v300_v5  ;;  %782 = vmatprep.subr.bf16.mxu0 %v1010_v58  ;;  %v1027_v5 = vld [vmem:[#allocation9 + $0xc0] ss:$8 sps:$4 sm:$0xff]  }
 0x294   :  { %783 = vmatpush1.bf16.msra.mxu0 %v1012_v59 }
 0x295   :  { %784 = vmatprep.subr.bf16.mxu0 %v1013_v60 }
 0x297   :  { %v1046_v6 = vpop.eup %1045 }
 0x298   :  { %v302_v10 = vmul.f32 %v1046_v6, %v297_v7  ;;  %785 = vmatpush1.bf16.msra.mxu0 %v1015_v61  ;;  %v1028_v6 = vld [vmem:[#allocation9 + $0xd4] ss:$8 sps:$4 sm:$0xff]   ;;  %v1030_v7 = vld [vmem:[#allocation9 + $0xd0] ss:$8 sps:$4 sm:$0xff]  }
 0x299   :  { %786 = vmatprep.subr.bf16.mxu0 %v1016_v62 }
 0x29b   :  { %v1048_v9 = vpop.eup %1047 }
 0x29c   :  { %v304_v11 = vmul.f32 %v1048_v9, %v298_v8  ;;  %787 = vmatpush1.bf16.msra.mxu0 %v1018_v63  ;;  %v1031_v8 = vld [vmem:[#allocation9 + $0xe4] ss:$8 sps:$4 sm:$0xff]   ;;  %v1033_v9 = vld [vmem:[#allocation9 + $0xe0] ss:$8 sps:$4 sm:$0xff]  }
 0x29d   :  { %788 = vmatprep.subr.bf16.mxu0 %v1019_v0 }
 0x29e   :  { %v305_v12 = vpack.c.bf16 %v304_v11, %v302_v10  ;;  %v1034_v10 = vld [vmem:[#allocation9 + $0xf4] ss:$8 sps:$4 sm:$0xff]   ;;  %v1036_v11 = vld [vmem:[#allocation9 + $0xf0] ss:$8 sps:$4 sm:$0xff]  }
 0x2a0   :  { %447 = vmatmul.mubr.bf16.vlgmr.msra.gmra.mrb[4].mxu1 %v305_v12  ;;  %789 = vmatpush1.bf16.msra.mxu0 %v1021_v1 }
 0x2a1   :  { %790 = vmatprep.subr.bf16.mxu0 %v1022_v2 }
 0x2a4   :  { %791 = vmatpush1.bf16.msra.mxu0 %v1024_v3 }
 0x2a5   :  { %792 = vmatprep.subr.bf16.mxu0 %v1025_v4 }
 0x2a8   :  { %793 = vmatpush1.bf16.msra.mxu0 %v1027_v5 }
 0x2a9   :  { %794 = vmatprep.subr.bf16.mxu0 %v1028_v6 }
 0x2ac   :  { %795 = vmatpush1.bf16.msra.mxu0 %v1030_v7 }
 0x2ad   :  { %796 = vmatprep.subr.bf16.mxu0 %v1031_v8 }
 0x2b0   :  { %797 = vmatpush1.bf16.msra.mxu0 %v1033_v9 }
 0x2b1   :  { %798 = vmatprep.subr.bf16.mxu0 %v1034_v10 }
 0x2b4   :  { %799 = vmatpush1.bf16.msra.mxu0 %v1036_v11 }
 0x373   :  { %v448_v20 = vpop.f32.mrb[4].mxu1 }
 0x374   :  { %v449_v21 = vadd.f32 %v448_v20, %v327_v18  ;;  %v450_v22 = vpop.f32.mrb[5].mxu1  ;;  %v457_v20 = vld [vmem:[%s1395_s7] sm:$0x3] }
 0x375   :  { %v451_v23 = vadd.f32 %v450_v22, %v331_v19  ;;  %v452_v24 = vpop.f32.mrb[6].mxu1  ;;  %v496_v22 = vrot.slane %v457_v20, %v1329_v15 }
 0x376   :  { %v453_v25 = vadd.f32 %v452_v24, %v327_v18  ;;  %v454_v26 = vpop.f32.mrb[7].mxu1 }
 0x377   :  { %v455_v27 = vadd.f32 %v454_v26, %v331_v19  ;;  %v459_v28 = vadd.f32 %v451_v23, %v449_v21 }
 0x379   :  { %460 = vadd.xlane.f32.xlu0 %v459_v28  ;;  %v462_v29 = vadd.f32 %v455_v27, %v453_v25 }
 0x37b   :  { %463 = vadd.xlane.f32.xlu1 %v462_v29 }
 0x406   :  { %v461_v32 = vpop.xlane.xlu0 %460 }
 0x407   :  { %v466_v33 = vmul.f32 0.00390625, %v461_v32 }
 0x408   :  { %v464_v34 = vpop.xlane.xlu1 %463 }
 0x409   :  { %v1338_v35 = vsub.f32 %v449_v21, %v466_v33  ;;  %v1340_v36 = vsub.f32 %v451_v23, %v466_v33  ;;  %v467_v37 = vmul.f32 0.00390625, %v464_v34  ;;  %v458_v21 = vld [vmem:[%s1396_s8] sm:$0x3]  ;;  %v500_v23 = vrot.slane %v457_v20, %v1334_v17 }
 0x40a   :  { %v515_v28 = vrot.slane %v458_v21, %v1334_v17 }
 0x40b   :  { %v1342_v38 = vsub.f32 %v453_v25, %v467_v37  ;;  %v1344_v39 = vsub.f32 %v455_v27, %v467_v37  ;;  %v472_v40 = vmul.f32 %v1338_v35, %v1338_v35  ;;  %v473_v41 = vmul.f32 %v1340_v36, %v1340_v36 }
 0x40c   :  { %v511_v27 = vrot.slane %v458_v21, %v1329_v15 }
 0x40d   :  { %v476_v42 = vadd.f32 %v473_v41, %v472_v40  ;;  %v474_v43 = vmul.f32 %v1342_v38, %v1342_v38  ;;  %v475_v44 = vmul.f32 %v1344_v39, %v1344_v39 }
 0x40f   :  { %477 = vadd.xlane.f32.xlu0 %v476_v42  ;;  %v479_v45 = vadd.f32 %v475_v44, %v474_v43 }
 0x411   :  { %480 = vadd.xlane.f32.xlu1 %v479_v45 }
 0x49c   :  { %v478_v12 = vpop.xlane.xlu0 %477 }
 0x49d   :  { %v482_v13 = vmul.f32 0.00390625, %v478_v12 }
 0x49e   :  { %v481_v14 = vpop.xlane.xlu1 %480 }
 0x49f   :  { %v484_v16 = vadd.f32 1e-05, %v482_v13  ;;  %v483_v18 = vmul.f32 0.00390625, %v481_v14  ;;  %v596_v14 = vld [vmem:[%s1398_s10] sm:$0x3]  ;;  %s1157_s10 = scalar_lea.vmem %s835_s17, 256 }
 0x4a0   :  { %p1158_p4 = scmp.ne.s32.totalorder %s835_s17, %s1157_s10  ;;  %p1163_p6 = scmp.lt.s32.totalorder %s1157_s10, %s1157_s10 }
 0x4a1   :  { %1049 = vrsqrt.f32 %v484_v16  ;;  %v485_v19 = vadd.f32 1e-05, %v483_v18  ;;  %v601_v16 = vrot.slane %v596_v14, %v1329_v15  ;;  %v605_v18 = vrot.slane %v596_v14, %v1334_v17 }
 0x4a2   :  { %p1164_p7 = por %p1163_p6, %p1162_p5 }
 0x4a3   :  { %1051 = vrsqrt.f32 %v485_v19 }
 0x4a4   :  { %p1165_p8 = pnand %p1164_p7, %p1158_p4 }
 0x4ab   :  { %v1050_v24 = vpop.eup %1049 }
 0x4ac   :  { %v488_v25 = vmul.f32 %v1050_v24, %v1338_v35  ;;  %v489_v26 = vmul.f32 %v1050_v24, %v1340_v36 }
 0x4ad   :  { %v1052_v29 = vpop.eup %1051 }
 0x4ae   :  { %v490_v30 = vmul.f32 %v1052_v29, %v1342_v38  ;;  %v491_v31 = vmul.f32 %v1052_v29, %v1344_v39  ;;  %v504_v32 = vmul.f32 %v500_v23, %v489_v26  ;;  %v503_v33 = vmul.f32 %v496_v22, %v488_v25 }
 0x4b0   :  { %v506_v34 = vmul.f32 %v500_v23, %v491_v31  ;;  %v519_v37 = vadd.f32 %v515_v28, %v504_v32  ;;  %v505_v40 = vmul.f32 %v496_v22, %v490_v30  ;;  %v518_v41 = vadd.f32 %v511_v27, %v503_v33 }
 0x4b2   :  { %v521_v42 = vadd.f32 %v515_v28, %v506_v34  ;;  %v523_v43 = vmin.f32 %v519_v37, 20.0  ;;  %v520_v35 = vadd.f32 %v511_v27, %v505_v40  ;;  %v522_v44 = vmin.f32 %v518_v41, 20.0 }
 0x4b4   :  { %v525_v36 = vmin.f32 %v521_v42, 20.0  ;;  %v528_v45 = vmul.f32 1.442695, %v523_v43  ;;  %v524_v46 = vmin.f32 %v520_v35, 20.0  ;;  %v526_v47 = vmul.f32 1.442695, %v522_v44 }
 0x4b6   :  { %1053 = vpow2.f32 %v528_v45  ;;  %v532_v48 = vmul.f32 1.442695, %v525_v36  ;;  %v530_v49 = vmul.f32 1.442695, %v524_v46 }
 0x4b7   :  { %1055 = vpow2.f32 %v526_v47 }
 0x4b8   :  { %1057 = vpow2.f32 %v532_v48 }
 0x4b9   :  { %1059 = vpow2.f32 %v530_v49 }
 0x4c0   :  { %v1054_v38 = vpop.eup %1053 }
 0x4c1   :  { %v1056_v39 = vpop.eup %1055  ;;  %v535_v50 = vadd.f32 2.0, %v1054_v38 }
 0x4c2   :  { %v1058_v51 = vpop.eup %1057  ;;  %v534_v52 = vadd.f32 2.0, %v1056_v39 }
 0x4c3   :  { %v1060_v53 = vpop.eup %1059  ;;  %v537_v54 = vadd.f32 2.0, %v1058_v51  ;;  %v539_v55 = vmul.f32 %v1054_v38, %v535_v50 }
 0x4c4   :  { %v536_v56 = vadd.f32 2.0, %v1060_v53  ;;  %v538_v57 = vmul.f32 %v1056_v39, %v534_v52 }
 0x4c5   :  { %v541_v58 = vmul.f32 %v1058_v51, %v537_v54  ;;  %v547_v59 = vadd.f32 2.0, %v539_v55  ;;  %v543_v2 = vmul.f32 %v539_v55, %v519_v37 }
 0x4c6   :  { %v540_v60 = vmul.f32 %v1060_v53, %v536_v56  ;;  %v546_v61 = vadd.f32 2.0, %v538_v57  ;;  %v542_v5 = vmul.f32 %v538_v57, %v518_v41 }
 0x4c7   :  { %v549_v62 = vadd.f32 2.0, %v541_v58  ;;  %1061 = vrcp.f32 %v547_v59  ;;  %v545_v3 = vmul.f32 %v541_v58, %v521_v42 }
 0x4c8   :  { %v548_v63 = vadd.f32 2.0, %v540_v60  ;;  %1063 = vrcp.f32 %v546_v61  ;;  %v544_v6 = vmul.f32 %v540_v60, %v520_v35 }
 0x4c9   :  { %1065 = vrcp.f32 %v549_v62 }
 0x4ca   :  { %1067 = vrcp.f32 %v548_v63 }
 0x4d1   :  { %v1062_v0 = vpop.eup %1061 }
 0x4d2   :  { %v1064_v1 = vpop.eup %1063  ;;  %v553_v8 = vmul.f32 %v1062_v0, %v543_v2 }
 0x4d3   :  { %v1066_v4 = vpop.eup %1065  ;;  %v551_v10 = vmul.f32 %v1064_v1, %v542_v5 }
 0x4d4   :  { %v1068_v7 = vpop.eup %1067  ;;  %v557_v9 = vmul.f32 %v1066_v4, %v545_v3 }
 0x4d5   :  { %v555_v11 = vmul.f32 %v1068_v7, %v544_v6 }
 0x4d6   :  { %v559_v12 = vpack.c.bf16 %v557_v9, %v553_v8 }
 0x4d7   :  { %v558_v13 = vpack.c.bf16 %v555_v11, %v551_v10 }
 0x4d8   :  { %800 = vmatprep.mubr.bf16.mxu0 %v559_v12 }
 0x4d9   :  { %801 = vmatmul.mubr.bf16.vlgmr.msra.gmra.mrb[0].mxu0 %v558_v13 }
 0x5ac   :  { %v802_v19 = vpop.f32.mrb[0].mxu0 }
 0x5ad   :  { %v803_v20 = vadd.f32 %v802_v19, %v601_v16  ;;  %v804_v21 = vpop.f32.mrb[1].mxu0 }
 0x5ae   :  { %v805_v22 = vadd.f32 %v804_v21, %v605_v18  ;;  %v806_v23 = vpop.f32.mrb[2].mxu0 }
 0x5af   :  { %v807_v24 = vadd.f32 %v806_v23, %v601_v16  ;;  %v808_v25 = vpop.f32.mrb[3].mxu0 }
 0x5b0   :  { %v913_v26 = vpack.c.bf16 %v805_v22, %v803_v20  ;;  %v809_v27 = vadd.f32 %v808_v25, %v605_v18 }
 0x5b2   :  { %823 = vst [vmem:[#allocation11] sm:$0xff] %v913_v26  ;;  %v914_v28 = vpack.c.bf16 %v809_v27, %v807_v24 }
 0x5b4   :  { %824 = vst [vmem:[#allocation11 + $0x8] sm:$0xff] %v914_v28 }
 0x5b5   :  { %1168 = shalt.err (!%p1165_p8)
}
 0x5b6   :  { %s1169_s22 = scalar_lea.hbm %s1399_s11, 256 }
 0x5b7   :  { %p1170_p9 = scmp.ne.s32.totalorder %s1399_s11, %s1169_s22  ;;  %p1173_p10 = scmp.lt.u32.totalorder %s1169_s22, %s1399_s11 }
 0x5b9   :  { %p1175_p11 = pnand %p1173_p10, %p1170_p9 }
 0x5bb   :  { %1178 = shalt.err (!%p1175_p11)
}
 0x5bc   :  { %840 = dma.vmem_to_hbm [thread:$0]  %s835_s17, 256, %s1399_s11, [#allocation5], %s1192_s0, %s1192_s0, %s1193_s20  }
 0x5bd   :  { %1185 = dma.done.wait [#allocation5], 256  }
 0x5be   :  { %1186 = vsyncadd [#allocation5], 4294967040 }
 0x5bf   :  { %844 = vsyncpa [#allocation4], 1 }
 0x5c0   :  { %845 = vsyncpa [#allocation7], 1 }
 0x5c1   :  { %846 = vsyncpa [#allocation10], 1 }
 0x5c2   :  { %847 = vsyncpa [#allocation5], 1 }

</bundles_post_ra>
